<compile_context>
chip_gen: v5e
topology: v5e:2x2
jax: 0.10.0
libtpu: 0.0.40
codegen_flags: <defaults>
</compile_context>

<pallas_src>
import jax
import jax.numpy as jnp
from jax.experimental import pallas as pl
from jax.experimental.pallas import tpu as pltpu


def _proj_kernel(w_ref, x_ref, o_ref):
    # w_ref: (C_out, C_in)  weight, same block every grid step (VMEM-resident)
    # x_ref: (C_in, ts)     activation tile, spatial on the lane dim
    # o_ref: (C_out, ts)    output tile, lane-dense store
    o_ref[...] = jnp.dot(
        w_ref[...], x_ref[...], preferred_element_type=jnp.float32
    ).astype(o_ref.dtype)


def _choose_spatial_tile(hw, c_in, c_out, itemsize, budget_bytes=12 * 1024 * 1024):
    """Largest multiple-of-128 spatial tile fitting a double-buffered VMEM budget.

    Budget ~12 MiB keeps us comfortably under the default scoped VMEM limit on
    all generations (16 MiB on v5e, 32 MiB on v6e/v7x; 64 MiB physical on v7x).
    """
    avail = budget_bytes - 2 * c_in * c_out * itemsize          # resident weight
    ts = avail // (2 * (c_in + c_out) * itemsize)               # 2x in + 2x out bufs
    ts = (ts // 128) * 128
    ts = max(128, min(2048, ts))
    hw_pad128 = ((hw + 127) // 128) * 128
    return min(ts, hw_pad128)


def projection_network(x_nchw, weight_oc_ic, *, ts=None):
    """1x1 conv, no bias. x_nchw: (B, C_in, H, W); weight: (C_out, C_in)."""
    B, C_in, H, W = x_nchw.shape
    C_out, C_in_w = weight_oc_ic.shape
    assert C_in_w == C_in
    HW = H * W

    if ts is None:
        ts = _choose_spatial_tile(HW, C_in, C_out, x_nchw.dtype.itemsize)

    # NCHW -> (B, C_in, H*W): contiguous reshape, no data movement.
    x_flat = x_nchw.reshape(B, C_in, HW)

    # Pad the spatial axis so ts-wide tiles cover it exactly (ts is a mult of 128).
    hw_pad = pl.cdiv(HW, ts) * ts
    if hw_pad != HW:
        x_flat = jnp.pad(x_flat, ((0, 0), (0, 0), (0, hw_pad - HW)))

    grid = (B, hw_pad // ts)

    out_flat = pl.pallas_call(
        _proj_kernel,
        out_shape=jax.ShapeDtypeStruct((B, C_out, hw_pad), x_nchw.dtype),
        grid_spec=pltpu.PrefetchScalarGridSpec(
            num_scalar_prefetch=0,
            grid=grid,
            in_specs=[
                # Full weight, constant block index -> stays resident in VMEM.
                pl.BlockSpec((C_out, C_in), lambda b, s: (0, 0)),
                # Activation tile: batch b (squeezed), all channels, spatial window s.
                pl.BlockSpec((None, C_in, ts), lambda b, s: (b, 0, s)),
            ],
            out_specs=pl.BlockSpec((None, C_out, ts), lambda b, s: (b, 0, s)),
        ),
        compiler_params=pltpu.CompilerParams(
            # Both axes are independent -> shard across v7x's 2 TensorCores.
            dimension_semantics=("parallel", "parallel"),
            vmem_limit_bytes=32 * 1024 * 1024,
        ),
    )(weight_oc_ic, x_flat)

    if hw_pad != HW:
        out_flat = out_flat[:, :, :HW]
    # (B, C_out, H*W) -> NCHW, free reshape.
    return out_flat.reshape(B, C_out, H, W)


if __name__ == "__main__":
    key = jax.random.PRNGKey(0)
    k_x, k_w = jax.random.split(key)

    B, C_in, C_out, Hs, Ws = 2, 4, 8, 16, 16

    x = jax.random.normal(k_x, (B, C_in, Hs, Ws), dtype=jnp.float32)
    # Deterministic weight init (roughly Conv2d kaiming-uniform scale).
    bound = 1.0 / (C_in ** 0.5)
    weight = jax.random.uniform(
        k_w, (C_out, C_in), minval=-bound, maxval=bound, dtype=jnp.float32
    )

    out = jax.block_until_ready(projection_network(x, weight))

    # Reference: 1x1 conv == channel-wise einsum.
    ref = jnp.einsum("oc,bchw->bohw", weight, x)
    assert out.shape == (B, C_out, Hs, Ws)
    assert jnp.allclose(out, ref, atol=1e-5, rtol=1e-5)

    print("KERNEL_OK")
</pallas_src>

<mosaic_0001>
module attributes {stable_mosaic.version = 11 : i64} {
  func.func @_proj_kernel(%arg0: i32, %arg1: i32, %arg2: memref<8x4xf32, #tpu.memory_space<vmem>>, %arg3: memref<1x4x256xf32, #tpu.memory_space<vmem>>, %arg4: memref<1x8x256xf32, #tpu.memory_space<vmem>>) attributes {dimension_semantics = [#tpu.dimension_semantics<parallel>, #tpu.dimension_semantics<parallel>], iteration_bounds = array<i64: 2, 1>, scalar_prefetch = 0 : i64, scratch_operands = 0 : i64, tpu.core_type = #tpu.core_type<tc>, window_params = [{pipeline_mode = #tpu.pipeline_mode<synchronous>, transform_indices = @transform_0, window_bounds = array<i64: 8, 4>}, {transform_indices = @transform_1, window_bounds = array<i64: 1, 4, 256>}, {transform_indices = @transform_2, window_bounds = array<i64: 1, 8, 256>}]} {
    %c0 = arith.constant 0 : index
    %c0_0 = arith.constant 0 : index
    %0 = vector.load %arg2[%c0, %c0_0] : memref<8x4xf32, #tpu.memory_space<vmem>>, vector<8x4xf32>
    %c0_1 = arith.constant 0 : index
    %c0_2 = arith.constant 0 : index
    %c0_3 = arith.constant 0 : index
    %1 = vector.load %arg3[%c0_1, %c0_2, %c0_3] : memref<1x4x256xf32, #tpu.memory_space<vmem>>, vector<1x4x256xf32>
    %2 = vector.shape_cast %1 : vector<1x4x256xf32> to vector<4x256xf32>
    %cst = arith.constant dense<0.000000e+00> : vector<8x256xf32>
    %3 = tpu.matmul %0, %2, %cst {dimension_numbers = #tpu.dot_dimension_numbers<[1], [0], [0], [1], [0, 0, 1, 1], [], []>} : vector<8x4xf32>, vector<4x256xf32>, vector<8x256xf32> -> vector<8x256xf32>
    %c0_4 = arith.constant 0 : index
    %c0_5 = arith.constant 0 : index
    %c0_6 = arith.constant 0 : index
    %4 = vector.load %arg4[%c0_4, %c0_5, %c0_6] : memref<1x8x256xf32, #tpu.memory_space<vmem>>, vector<1x8x256xf32>
    %5 = vector.shape_cast %4 : vector<1x8x256xf32> to vector<8x256xf32>
    %6 = vector.shape_cast %3 : vector<8x256xf32> to vector<1x8x256xf32>
    tpu.vector_store %arg4[%c0_4, %c0_5, %c0_6], %6 {strides = array<i32>} : memref<1x8x256xf32, #tpu.memory_space<vmem>>, vector<1x8x256xf32>,
    return
  }
  func.func @transform_0(%arg0: i32, %arg1: i32) -> (i32, i32) {
    %c0_i32 = arith.constant 0 : i32
    %c0_i32_0 = arith.constant 0 : i32
    %c0_i32_1 = arith.constant 0 : i32
    return %c0_i32, %c0_i32_0 : i32, i32
  }
  func.func @transform_1(%arg0: i32, %arg1: i32) -> (i32, i32, i32) {
    %c0_i32 = arith.constant 0 : i32
    %c0_i32_0 = arith.constant 0 : i32
    return %arg0, %c0_i32, %arg1 : i32, i32, i32
  }
  func.func @transform_2(%arg0: i32, %arg1: i32) -> (i32, i32, i32) {
    %c0_i32 = arith.constant 0 : i32
    %c0_i32_0 = arith.constant 0 : i32
    return %arg0, %c0_i32, %arg1 : i32, i32, i32
  }
}

</mosaic_0001>

<bundles_post_ra>
// kernel: tpu_custom_call.1
= control target key start
LH: loop header
LB: loop body
LE: loop exit
PB: predicated region body
PF: predicated region fallthrough
CT: control target
= control target key end

     0   :  { %7 = vsyncpa [#allocation3], 0  ;;  %s678_s0 = inlined_call_operand.vmem [shape: f32[8,4], index: 0, kind: input, shape index: {}]   ;;  %s679_s1 = inlined_call_operand.hbm [shape: f32[2,4,256], index: 1, kind: input, shape index: {}]   ;;  %s680_s2 = inlined_call_operand.hbm [shape: f32[2,8,256], index: 2, kind: output, shape index: {}]  }
   0x1   :  { %9 = vsyncpa [#allocation3 + $0x1], 0 }
   0x2   :  { %10 = vsyncpa [#allocation4], 0 }
   0x3   :  { %12 = vsyncpa [#allocation4 + $0x1], 0  ;;  %s554_s9 = smov 0   ;;  %s556_s10 = smov 0  }
   0x4   :  { %s558_s11 = smov 0   ;;  %s560_s12 = smov 0  }
   0x5   :  { %s562_s13 = smov 0   ;;  %s564_s14 = smov 0  }
   0x6 LB: > { %s342_s15 = sadd.s32 4294967295, %s537_s14   ;;  %s343_s16 = sadd.s32 4294967294, %s537_s14   ;;  %s537_s14 = sphi %s564_s14, %s18_s14   ;;  %s533_s13 = sphi %s562_s13, %s689_s13   ;;  %s529_s12 = sphi %s560_s12, %s688_s12   ;;  %s525_s11 = sphi %s558_s11, %s687_s11   ;;  %s521_s10 = sphi %s556_s10, %s686_s10   ;;  %s517_s9 = sphi %s554_s9, %s685_s9  }
   0x7   : > { %s30_s17 = sadd.s32 1, %s533_s13  ;;  %s60_s18 = sadd.s32 1, %s525_s11 }
   0x8   : > { %p32_p0 = scmp.ge.s32.totalorder %s30_s17, 2  ;;  %p67_p1 = scmp.ne.s32.totalorder %s525_s11, %s521_s10 }
   0x9   : > { %p68_p2 = scmp.eq.s32.totalorder %s537_s14, 0  ;;  %p73_p3 = scmp.ne.s32.totalorder %s521_s10, %s517_s9 }
   0xa   : > { %s691_s17 = smov (%p32_p0, %s30_s17), 0  ;;  %p74_p5 = scmp.eq.s32.totalorder %s342_s15, 0 }
   0xb   : > { %p595_p4 = por %p68_p2, %p67_p1  ;;  %s55_s20 = ssub.s32 %s533_s13, %s691_s17 }
   0xc   : > { %p99_p6 = scmp.eq.s32.totalorder %s342_s15, 1  ;;  %p58_p7 = scmp.eq.s32.totalorder %s55_s20, 0 }
   0xd   : > { %p601_p8 = por %p74_p5, %p73_p3  ;;  %p105_p10 = scmp.eq.s32.totalorder %s343_s16, 1 }
   0xe   : > { %p605_p9 = por %p99_p6, %p67_p1  ;;  %p345_p12 = scmp.ge.s32.totalorder %s537_s14, 2 }
   0xf   : > { %s610_s23 = scalar_select %p58_p7, %s525_s11, %s60_s18  }
  0x10   : > { %p612_p11 = por %p105_p10, %p73_p3  ;;  %p375_p13 = scmp.lt.s32.totalorder %s537_s14, 2 }
  0x11   : > { %s128_s25 = sand.u32 1, %s525_s11   ;;  %s361_s27 = sshll.u32 %s533_s13, 3 }
  0x12   : > { %s346_s26 = sshll.u32 %s128_s25, 3  ;;  %s139_s30 = scalar_lea.hbm %s679_s1, %s361_s27 }
  0x13   : > { %s132_s3 = scalar_lea.vmem [#allocation2], %s346_s26  ;;  %s141_s5 = sshll.u32 %s139_s30, 4  ;;  %s142_s5 = int_to_ptr.hbm [resolvable:$true] %s141_s5 }
  0x14   : > { %s143_s4 = sshll.u32 %s132_s3, 4  ;;  %p368_p0 = pnand %p375_p13, %p595_p4  ;;  %s144_s4 = int_to_ptr.vmem [resolvable:$true] %s143_s4 }
  0x15   : > { %p349_p1 = scmp.ge.s32.totalorder %s537_s14, 1  ;;  %p148_p2 = scmp.lt.s32.totalorder %s537_s14, 3 }
  0x16   : > { %s129_s6 = scalar_lea.sflag [#allocation3], %s128_s25 }
  0x17   : > { %370 = dma.hbm_to_vmem [thread:$0]  (!%p368_p0), %s142_s5, 128, %s144_s4, %s129_s6  }
  0x18   : > { %p149_p3 = pnand %p349_p1, %p148_p2 }
  0x19   : > { %s628_s7 = sand.u32 (!%p149_p3), 1, %s521_s10  }
  0x1a   : > { %152 = sbr.rel (%p149_p3) target bundleno = 172 (0xac), region = 28  ;;  %s350_s8 = sshll.u32 (!%p149_p3), %s628_s7, 3 }
  0x1b   : > { %s155_s15 = scalar_lea.sflag (!%p149_p3), [#allocation3], %s628_s7  ;;  %s158_s16 = scalar_lea.vmem (!%p149_p3), [#allocation2], %s350_s8 }
  0x1f   : > { %508 = dma.done.wait (%p601_p8), %s155_s15, 128  }
  0x20   : > { %510 = vsyncadd (%p601_p8), %s155_s15, 4294967168  ;;  %v183_v0 = vld [vmem:[%s158_s16] sm:$0xff]  ;;  %vm192_vm0 = vcmask 1043456   ;;  %v182_v1 = vld [vmem:[%s678_s0] sm:$0xff]  ;;  %vm188_vm1 = vcmask 31744   ;;  %s351_s20 = sshll.u32 %s628_s7, 4 }
  0x21   : > { %185 = vst [vmem:[#allocation1] ss:$2 sm:$0xff] %v183_v0  ;;  %s362_s21 = sshll.u32 %s529_s12, 4  ;;  %s179_s28 = scalar_lea.vmem [#allocation5], %s351_s20 }
  0x22   : > { %s253_s27 = scalar_lea.hbm %s680_s2, %s362_s21  ;;  %s255_s29 = sshll.u32 %s179_s28, 4  ;;  %s256_s29 = int_to_ptr.vmem [resolvable:$true] %s255_s29 }
  0x23   : > { %s257_s30 = sshll.u32 %s253_s27, 4  ;;  %s240_s3 = scalar_lea.sflag [#allocation4], %s628_s7  ;;  %s258_s30 = int_to_ptr.hbm [resolvable:$true] %s257_s30 }
  0x24   : > { %s469_s4 = sshra.s32 %s258_s30, 4  ;;  %s475_s8 = scalar_lea.hbm %s680_s2, 32  ;;  %s470_s4 = int_to_ptr.hbm [resolvable:$true] %s469_s4 }
  0x25   : > { %s471_s5 = scalar_lea.hbm %s470_s4, 16  ;;  %p476_p7 = scmp.lt.s32.totalorder %s470_s4, %s680_s2 }
  0x26   : > { %p472_p4 = scmp.ne.s32.totalorder %s470_s4, %s471_s5  ;;  %p477_p8 = scmp.lt.s32.totalorder %s475_s8, %s471_s5 }
  0x28   : > { %v186_v2 = vld.sshfl [vmem:[#allocation1] sm:$0xff pattern:$0x75316420]  ;;  %v187_v3 = vld.sshfl [vmem:[#allocation1 + $0x8] sm:$0xff pattern:$0x75316420]  ;;  %p473_p5 = pnand %p472_p4, %p605_p9  ;;  %p478_p10 = por %p477_p8, %p476_p7 }
  0x29   : > { %352 = vmatpush.msk.msra.mxu0 %vm192_vm0, %v186_v2  ;;  %354 = vmatpush.msk.msra.mxu1 %vm192_vm0, %v187_v3 }
  0x2a   : > { %353 = vmatmul.msk.f32.vlgmr.msra.gmra.mxu0 %vm188_vm1, %v182_v1  ;;  %355 = vmatmul.msk.f32.vlgmr.msra.gmra.mxu1 %vm188_vm1, %v182_v1  ;;  %p474_p6 = pneg %p473_p5 }
  0x2c   : > { %p479_p13 = pnand %p478_p10, %p474_p6 }
  0xa7   : > { %v214_v4 = vpop.f32.mrf.mxu0  ;;  %v234_v5 = vpop.f32.mrf.mxu1 }
  0xa8   : > { %237 = vst [vmem:[%s179_s28] sm:$0xff] %v214_v4 }
  0xa9   : > { %238 = vst [vmem:[%s179_s28 + $0x8] sm:$0xff] %v234_v5 }
  0xaa   : > { %482 = shalt.err (!%p479_p13)
}
  0xab   : > { %365 = dma.vmem_to_hbm [thread:$0]  (%p605_p9), %s256_s29, 256, %s258_s30, %s240_s3  }
  0xac PF: > { %s269_s7 = sand.u32 1, %s517_s9   ;;  %p372_p0 = pnand %p345_p12, %p612_p11 }
  0xad   : > { %s270_s18 = scalar_lea.sflag [#allocation4], %s269_s7 }
  0xae   : > { %p373_p1 = pneg %p372_p0 }
  0xb0   : > { %512 = dma.done.wait (%p373_p1), %s270_s18, 256  }
  0xb1   : > { %514 = vsyncadd (%p373_p1), %s270_s18, 4294967040  ;;  %s18_s14 = sadd.s32 1, %s537_s14   ;;  %s685_s9 = smov %s521_s10 }
  0xb2   : > { %p15_p2 = scmp.ge.s32.totalorder %s18_s14, 4   ;;  %s686_s10 = smov %s525_s11 }
  0xb3   : > { %s687_s11 = smov %s610_s23  ;;  %s688_s12 = smov %s533_s13 }
  0xb4   : > { %s689_s13 = smov %s691_s17  ;;  %17 = sbr.rel (!%p15_p2) target bundleno = 6 (0x6), region = 73 }
  0xb9   :  { %276 = vsyncpa [#allocation3], 1 }
  0xba   :  { %278 = vsyncpa [#allocation3 + $0x1], 1 }
  0xbb   :  { %279 = vsyncpa [#allocation4], 1 }
  0xbc   :  { %281 = vsyncpa [#allocation4 + $0x1], 1 }

</bundles_post_ra>
